<compile_context>
chip_gen: v7x
topology: tpu7x:2x2x1
jax: 0.10.0
libtpu: 0.0.40
codegen_flags: <defaults>
</compile_context>

<pallas_src>
import jax
import jax.numpy as jnp
from jax import lax
from jax.experimental import pallas as pl
from jax.experimental.pallas import tpu as pltpu

K = 8  # JPEG block size (self.k in the PyTorch module)


# ----------------------------------------------------------------------------
# Generation-aware tiling budget
# ----------------------------------------------------------------------------
def _tpu_budget():
    """(target input-block bytes, vmem_limit_bytes) keyed off VMEM capacity."""
    try:
        info = pltpu.get_tpu_info()
        vmem = int(getattr(info, "vmem_capacity_bytes", 0) or 0)
    except Exception:
        vmem = 0
    if vmem and vmem <= (80 << 20):      # v7x-class: 64 MiB VMEM per TensorCore
        return 4 << 20, 28 << 20
    if vmem:                             # v5e / v6e: 128 MiB VMEM
        return 8 << 20, 64 << 20
    return 4 << 20, 32 << 20             # unknown backend: conservative


def _pick_rows(n_strips, strip_bytes, target_bytes, batch):
    """8-row strips per grid step.

    Always a divisor of n_strips (no remainder / oversize-tile corner case),
    preferring sublane-aligned (multiple of 8) or full-extent blocks, and
    keeping the flat grid length batch*(n_strips//rows) >= 2 for megacore.
    """
    divs = [d for d in range(1, n_strips + 1) if n_strips % d == 0]
    fits = [d for d in divs if d * strip_bytes <= target_bytes] or [1]
    aligned = [d for d in fits if d % 8 == 0 or d == n_strips]
    pool = aligned or fits
    rows = max(pool)
    if batch * (n_strips // rows) < 2:   # keep both v7x TensorCores busy
        smaller = [d for d in pool if d < rows]
        if smaller:
            rows = max(smaller)
    return rows


def _pick_group(rows, n_wblk):
    """Strips shuffled per loop iteration (bounds padded-temp live ranges)."""
    for g in (8, 4, 2, 1):
        if rows % g == 0 and (g * n_wblk <= 1024 or g == 1):
            return g
    return 1


# ----------------------------------------------------------------------------
# In-kernel shuffles: (group*8, n_wblk*bw) u32 -> (group, n_wblk*8*bw) u32
# ----------------------------------------------------------------------------
def _shuffle_fused(x, group, n_wblk, bw):
    # Single permutation (review recommendation).
    x = x.reshape(group, K, n_wblk, bw)
    x = jnp.transpose(x, (0, 2, 1, 3))
    return x.reshape(group, n_wblk * K * bw)


def _shuffle_minor(x, group, n_wblk, bw):
    # Same op expressed with minor-dim (last-two-axes) transposes only.
    x = x.reshape(group, K, n_wblk * bw)
    x = jnp.swapaxes(x, -1, -2)          # (group, n_wblk*bw, 8)
    x = x.reshape(group, n_wblk, bw, K)
    x = jnp.swapaxes(x, -1, -2)          # (group, n_wblk, 8, bw)
    return x.reshape(group, n_wblk * K * bw)


# ----------------------------------------------------------------------------
# Kernels
# ----------------------------------------------------------------------------
def _make_fast_kernel(rows, group, n_wblk, bw, shuffle):
    n_groups = rows // group

    def kernel(img_ref, out_ref):
        # img_ref: (rows*8, n_wblk*bw) u32 ; out_ref: (rows, n_wblk*8*bw) u32
        if n_groups == 1:
            out_ref[...] = shuffle(img_ref[...], group, n_wblk, bw)
        else:
            def body(g, carry):
                r0 = pl.multiple_of(g * (group * K), 8)
                src = img_ref[pl.ds(r0, group * K), :]
                out_ref[pl.ds(g * group, group), :] = shuffle(
                    src, group, n_wblk, bw)
                return carry

            lax.fori_loop(0, n_groups, body, 0)

    return kernel


def _build_fast(B, H, Wp, bw, rows, group, shuffle, vmem_limit):
    nH = H // K
    n_wblk = Wp // bw
    L = n_wblk * K * bw
    n_steps = nH // rows
    kernel = _make_fast_kernel(rows, group, n_wblk, bw, shuffle)

    def fn(x32):
        return pl.pallas_call(
            kernel,
            out_shape=jax.ShapeDtypeStruct((B, nH, L), jnp.uint32),
            grid_spec=pltpu.PrefetchScalarGridSpec(
                num_scalar_prefetch=0,
                grid=(B * n_steps,),      # flat 1-D grid -> even megacore split
                in_specs=[pl.BlockSpec(
                    (None, rows * K, Wp),
                    lambda g: (g // n_steps, g % n_steps, 0))],
                out_specs=pl.BlockSpec(
                    (None, rows, L),
                    lambda g: (g // n_steps, g % n_steps, 0)),
            ),
            compiler_params=pltpu.CompilerParams(
                dimension_semantics=("parallel",),
                vmem_limit_bytes=vmem_limit),
        )(x32)

    return fn


def _build_safe(B, H, Wp, bw):
    # Slicing-only safety net: only selected if both fused variants fail to
    # compile for a given shape.  Slow (lane-sparse stores, fine grid) but it
    # uses nothing beyond ref slicing so it always lowers.
    nH = H // K
    n_wblk = Wp // bw

    def kernel(img_ref, out_ref):
        for c in range(n_wblk):
            out_ref[c] = img_ref[:, c * bw:(c + 1) * bw]

    def fn(x32):
        return pl.pallas_call(
            kernel,
            out_shape=jax.ShapeDtypeStruct((B, nH * n_wblk, K, bw), jnp.uint32),
            grid_spec=pltpu.PrefetchScalarGridSpec(
                num_scalar_prefetch=0,
                grid=(B, nH),
                in_specs=[pl.BlockSpec((None, K, Wp), lambda b, r: (b, r, 0))],
                out_specs=pl.BlockSpec((None, n_wblk, K, bw),
                                       lambda b, r: (b, r, 0, 0)),
            ),
            compiler_params=pltpu.CompilerParams(
                dimension_semantics=("parallel", "parallel")),
        )(x32)

    return fn


# ----------------------------------------------------------------------------
# One-time-per-shape implementation selection (compile probe, off the hot path)
# ----------------------------------------------------------------------------
_IMPL_CACHE = {}


def _get_impl(B, H, Wp, bw):
    key = (B, H, Wp, bw)
    impl = _IMPL_CACHE.get(key)
    if impl is not None:
        return impl

    target_bytes, vmem_limit = _tpu_budget()
    nH = H // K
    n_wblk = Wp // bw
    rows = _pick_rows(nH, K * Wp * 4, target_bytes, B)
    group = _pick_group(rows, n_wblk)

    candidates = [
        _build_fast(B, H, Wp, bw, rows, group, _shuffle_fused, vmem_limit),
        _build_fast(B, H, Wp, bw, rows, group, _shuffle_minor, vmem_limit),
    ]
    spec = jax.ShapeDtypeStruct((B, H, Wp), jnp.uint32)
    impl = None
    for cand in candidates:
        try:
            jax.jit(cand).lower(spec).compile()   # catches Mosaic rejections
            impl = cand
            break
        except Exception:
            continue
    if impl is None:
        impl = _build_safe(B, H, Wp, bw)

    _IMPL_CACHE[key] = impl
    return impl


# ----------------------------------------------------------------------------
# Public wrapper (matches the PyTorch module's forward)
# ----------------------------------------------------------------------------
def block_splitting(image):
    """image: (B, H, W) -> (B, H*W/64, 8, 8), same as the PyTorch module."""
    B, H, W = image.shape
    assert H % K == 0 and W % K == 0, "H and W must be multiples of 8"
    dtype = image.dtype
    itemsize = image.dtype.itemsize
    assert 4 % itemsize == 0, f"unsupported dtype {dtype}"
    pack = 4 // itemsize

    # Pack `pack` adjacent columns into one u32 lane (layout-preserving bitcast)
    # so the kernel always shuffles 32-bit lanes.
    if pack > 1:
        x32 = lax.bitcast_convert_type(
            image.reshape(B, H, W // pack, pack), jnp.uint32)
    else:
        x32 = lax.bitcast_convert_type(image, jnp.uint32)
    Wp = W // pack
    bw = K // pack                      # 8x8 block width measured in u32 lanes

    out32 = _get_impl(B, H, Wp, bw)(x32)

    out = lax.bitcast_convert_type(out32, dtype)
    return out.reshape(B, (H // K) * (W // K), K, K)


def _reference(image):
    # Pure-JAX replica of the PyTorch forward, for verification.
    B, H, W = image.shape
    x = image.reshape(B, H // K, K, W // K, K)
    x = jnp.transpose(x, (0, 1, 3, 2, 4))
    return x.reshape(B, -1, K, K)


if __name__ == "__main__":
    key = jax.random.PRNGKey(0)

    # Case 1: small square image, f32 (native 32-bit path).
    B, H, W = 2, 16, 16
    image = jax.random.normal(key, (B, H, W), dtype=jnp.float32)
    out = jax.block_until_ready(block_splitting(image))
    assert out.shape == (B, (H * W) // 64, K, K), out.shape
    assert out.dtype == image.dtype
    assert jnp.array_equal(out, _reference(image)), "mismatch (f32, 16x16)"

    # Case 2: non-square image, f32.
    image2 = jax.random.normal(jax.random.PRNGKey(0), (2, 32, 48), dtype=jnp.float32)
    out2 = jax.block_until_ready(block_splitting(image2))
    assert out2.shape == (2, (32 * 48) // 64, K, K)
    assert jnp.array_equal(out2, _reference(image2)), "mismatch (f32, 32x48)"

    # Case 3: bf16 input (shuffled as packed u32 lane pairs).
    image3 = jax.random.normal(jax.random.PRNGKey(0), (2, 32, 48)).astype(jnp.bfloat16)
    out3 = jax.block_until_ready(block_splitting(image3))
    assert out3.shape == (2, (32 * 48) // 64, K, K)
    assert out3.dtype == jnp.bfloat16
    assert jnp.array_equal(out3, _reference(image3)), "mismatch (bf16, 32x48)"

    print("KERNEL_OK")
</pallas_src>

<mosaic_0001>
module attributes {stable_mosaic.version = 11 : i64} {
  func.func @kernel(%arg0: i32, %arg1: i32, %arg2: memref<1x8x16xi32, #tpu.memory_space<vmem>>, %arg3: memref<1x2x8x8xi32, #tpu.memory_space<vmem>>) attributes {dimension_semantics = [#tpu.dimension_semantics<parallel>, #tpu.dimension_semantics<parallel>], iteration_bounds = array<i64: 2, 2>, scalar_prefetch = 0 : i64, scratch_operands = 0 : i64, tpu.core_type = #tpu.core_type<tc>, window_params = [{transform_indices = @transform_0, window_bounds = array<i64: 1, 8, 16>}, {transform_indices = @transform_1, window_bounds = array<i64: 1, 2, 8, 8>}]} {
    %c0 = arith.constant 0 : index
    %c0_0 = arith.constant 0 : index
    %c0_1 = arith.constant 0 : index
    %0 = vector.load %arg2[%c0, %c0_0, %c0_1] : memref<1x8x16xi32, #tpu.memory_space<vmem>>, vector<1x8x8xi32>
    %1 = vector.shape_cast %0 : vector<1x8x8xi32> to vector<8x8xi32>
    %c0_2 = arith.constant 0 : index
    %c0_3 = arith.constant 0 : index
    %c0_4 = arith.constant 0 : index
    %c0_5 = arith.constant 0 : index
    %2 = vector.load %arg3[%c0_2, %c0_3, %c0_4, %c0_5] : memref<1x2x8x8xi32, #tpu.memory_space<vmem>>, vector<1x1x8x8xi32>
    %3 = vector.shape_cast %2 : vector<1x1x8x8xi32> to vector<8x8xi32>
    %4 = vector.shape_cast %1 : vector<8x8xi32> to vector<1x1x8x8xi32>
    tpu.vector_store %arg3[%c0_2, %c0_3, %c0_4, %c0_5], %4 {strides = array<i32>} : memref<1x2x8x8xi32, #tpu.memory_space<vmem>>, vector<1x1x8x8xi32>,
    %c0_6 = arith.constant 0 : index
    %c0_7 = arith.constant 0 : index
    %c8 = arith.constant 8 : index
    %5 = vector.load %arg2[%c0_6, %c0_7, %c8] : memref<1x8x16xi32, #tpu.memory_space<vmem>>, vector<1x8x8xi32>
    %6 = vector.shape_cast %5 : vector<1x8x8xi32> to vector<8x8xi32>
    %c0_8 = arith.constant 0 : index
    %c1 = arith.constant 1 : index
    %c0_9 = arith.constant 0 : index
    %c0_10 = arith.constant 0 : index
    %7 = vector.load %arg3[%c0_8, %c1, %c0_9, %c0_10] : memref<1x2x8x8xi32, #tpu.memory_space<vmem>>, vector<1x1x8x8xi32>
    %8 = vector.shape_cast %7 : vector<1x1x8x8xi32> to vector<8x8xi32>
    %9 = vector.shape_cast %6 : vector<8x8xi32> to vector<1x1x8x8xi32>
    tpu.vector_store %arg3[%c0_8, %c1, %c0_9, %c0_10], %9 {strides = array<i32>} : memref<1x2x8x8xi32, #tpu.memory_space<vmem>>, vector<1x1x8x8xi32>,
    return
  }
  func.func @transform_0(%arg0: i32, %arg1: i32) -> (i32, i32, i32) {
    %c0_i32 = arith.constant 0 : i32
    %c0_i32_0 = arith.constant 0 : i32
    return %arg0, %arg1, %c0_i32 : i32, i32, i32
  }
  func.func @transform_1(%arg0: i32, %arg1: i32) -> (i32, i32, i32, i32) {
    %c0_i32 = arith.constant 0 : i32
    %c0_i32_0 = arith.constant 0 : i32
    %c0_i32_1 = arith.constant 0 : i32
    return %arg0, %arg1, %c0_i32, %c0_i32_0 : i32, i32, i32, i32
  }
}

</mosaic_0001>

<bundles_post_ra>
// kernel: tpu_custom_call.1
= control target key start
LH: loop header
LB: loop body
LE: loop exit
PB: predicated region body
PF: predicated region fallthrough
CT: control target
= control target key end

     0   :  { %6 = vsyncpa [#allocation3], 0  ;;  %s704_s0 = inlined_call_operand.hbm [shape: u32[2,16,16], index: 0, kind: input, shape index: {}]   ;;  %s705_s1 = inlined_call_operand.hbm [shape: u32[2,4,8,8], index: 1, kind: output, shape index: {}]  }
   0x1   :  { %8 = vsyncpa [#allocation3 + $0x1], 0 }
   0x2   :  { %9 = vsyncpa [#allocation4], 0 }
   0x3   :  { %11 = vsyncpa [#allocation4 + $0x1], 0  ;;  %s507_s6 = smov 0   ;;  %s509_s7 = smov 0  }
   0x4   :  { %s511_s8 = smov 0   ;;  %s513_s9 = smov 0  }
   0x5   :  { %s515_s10 = smov 0   ;;  %s517_s11 = smov 0  }
   0x6   :  { %s519_s12 = smov 0   ;;  %s521_s13 = smov 0  }
   0x7 LB: > { %s264_s14 = sadd.s32 4294967295, %s490_s13   ;;  %s265_s15 = sadd.s32 4294967294, %s490_s13   ;;  %s490_s13 = sphi %s521_s13, %s17_s13   ;;  %s486_s12 = sphi %s519_s12, %s722_s12   ;;  %s482_s11 = sphi %s517_s11, %s721_s11   ;;  %s478_s10 = sphi %s515_s10, %s720_s10   ;;  %s474_s9 = sphi %s513_s9, %s719_s9   ;;  %s470_s8 = sphi %s511_s8, %s718_s8   ;;  %s466_s7 = sphi %s509_s7, %s717_s7   ;;  %s462_s6 = sphi %s507_s6, %s716_s6  }
   0x8   : > { %s26_s16 = sadd.s32 1, %s482_s11  ;;  %s29_s17 = sadd.s32 1, %s486_s12 }
   0x9   : > { %p27_p0 = scmp.ge.s32.totalorder %s26_s16, 2  ;;  %s38_s18 = sadd.s32 1, %s470_s8 }
   0xa   : > { %p45_p1 = scmp.ne.s32.totalorder %s470_s8, %s466_s7  ;;  %p46_p2 = scmp.eq.s32.totalorder %s490_s13, 0 }
   0xb   : > { %s724_s16 = smov (%p27_p0, %s26_s16), 0  ;;  %s726_s17 = smov (!%p27_p0, %s29_s17), %s486_s12 }
   0xc   : > { %s34_s19 = ssub.s32 %s482_s11, %s724_s16  ;;  %p560_p3 = por %p46_p2, %p45_p1 }
   0xd   : > { %p31_p4 = scmp.ge.s32.totalorder %s726_s17, 2  ;;  %p51_p5 = scmp.ne.s32.totalorder %s466_s7, %s462_s6 }
   0xe   : > { %p52_p6 = scmp.eq.s32.totalorder %s264_s14, 0  ;;  %p77_p7 = scmp.eq.s32.totalorder %s264_s14, 3 }
   0xf   : > { %s728_s17 = smov (%p31_p4, %s726_s17), 0  ;;  %p83_p10 = scmp.eq.s32.totalorder %s265_s15, 3 }
  0x10   : > { %p568_p8 = por %p52_p6, %p51_p5  ;;  %p572_p9 = por %p77_p7, %p45_p1 }
  0x11   : > { %s33_s23 = ssub.s32 %s486_s12, %s728_s17  ;;  %p578_p12 = por %p83_p10, %p51_p5 }
  0x12   : > { %s709_s22 = scalar_select %p572_p9, 1, 0 }
  0x13   : > { %s35_s24 = sor.u32 %s34_s19, %s33_s23  ;;  %p293_p13 = scmp.lt.s32.totalorder %s490_s13, 4 }
  0x14   : > { %p36_p11 = scmp.eq.s32.totalorder %s35_s24, 0  ;;  %s103_s26 = sand.u32 1, %s470_s8  }
  0x15   : > { %s710_s25 = scalar_select %p578_p12, 1, 0 }
  0x16   : > { %s585_s27 = scalar_select %p36_p11, %s470_s8, %s38_s18  }
  0x17   : > { %s268_s28 = sshll.u32 %s103_s26, 3  ;;  %s269_s29 = sshll.u32 %s486_s12, 1 }
  0x18   : > { %s112_s30 = sadd.s32 %s482_s11, %s269_s29  ;;  %s107_s2 = scalar_lea.vmem [#allocation2], %s268_s28 }
  0x19   : > { %s116_s3 = sshll.u32 %s107_s2, 4  ;;  %s270_s4 = sshll.u32 %s112_s30, 7  ;;  %s589_s3 = int_to_ptr.vmem [resolvable:$true] %s116_s3 }
  0x1a   : > { %s594_s15 = scalar_lea.hbm %s704_s0, %s270_s4  ;;  %p598_p0 = pnand %p293_p13, %p560_p3 }
  0x1b   : > { %s104_s19 = scalar_lea.sflag [#allocation3], %s103_s26  ;;  %s362_s23 = scalar_lea.hbm %s594_s15, 128 }
  0x1c   : > { %p363_p4 = scmp.ne.s32.totalorder %s594_s15, %s362_s23  ;;  %p364_p5 = pneg %p598_p0 }
  0x1d   : > { %s367_s28 = scalar_lea.hbm %s704_s0, 512  ;;  %p368_p3 = scmp.lt.u32.totalorder %s594_s15, %s704_s0 }
  0x1e   : > { %p365_p6 = pnand %p364_p5, %p363_p4  ;;  %p369_p10 = scmp.lt.u32.totalorder %s367_s28, %s362_s23 }
  0x1f   : > { %p371_p13 = scmp.lt.u32.totalorder %s362_s23, %s594_s15 }
  0x20   : > { %p366_p7 = pneg %p365_p6  ;;  %p370_p11 = por %p369_p10, %p368_p3 }
  0x22   : > { %p372_p1 = por %p371_p13, %p370_p11 }
  0x24   : > { %p373_p2 = pnand %p372_p1, %p366_p7 }
  0x26   : > { %376 = shalt.err (!%p373_p2)
}
  0x27   : > { %s377_s26 = scalar_lea.vmem %s589_s3, 128  ;;  %s492_s2 = smov [#allocation2]  }
  0x28   : > { %p378_p4 = scmp.ne.s32.totalorder %s589_s3, %s377_s26  ;;  %s382_s4 = sshll.u32 %s492_s2, 4  ;;  %s383_s4 = int_to_ptr.vmem [resolvable:$false] %s382_s4 }
  0x29   : > { %s384_s5 = scalar_lea.vmem %s383_s4, 256  ;;  %p385_p9 = scmp.lt.s32.totalorder %s589_s3, %s383_s4 }
  0x2a   : > { %p380_p6 = pnand %p378_p4, %p364_p5  ;;  %p386_p3 = scmp.lt.s32.totalorder %s384_s5, %s377_s26 }
  0x2c   : > { %p381_p12 = pneg %p380_p6  ;;  %p387_p10 = por %p386_p3, %p385_p9 }
  0x2e   : > { %p388_p11 = pnand %p387_p10, %p381_p12 }
  0x30   : > { %391 = shalt.err (!%p388_p11)
}
  0x31   : > { %288 = dma.hbm_to_vmem [thread:$0]  (!%p598_p0), %s594_s15, 128, %s589_s3, %s104_s19  }
  0x32   : > { %p712_p1 = scmp.lt.s32.totalorder %s490_s13, 5  ;;  %p713_p2 = scmp.ge.s32.totalorder %s490_s13, 1 }
  0x34   : > { %p122_p5 = pnand %p713_p2, %p712_p1 }
  0x35   : > { %s634_s14 = sand.u32 (!%p122_p5), 1, %s466_s7  }
  0x36   : > { %125 = sbr.rel (%p122_p5) target bundleno = 193 (0xc1), region = 24  ;;  %s272_s23 = sshll.u32 (!%p122_p5), %s634_s14, 3 }
  0x37   : > { %s128_s20 = scalar_lea.sflag (!%p122_p5), [#allocation3], %s634_s14  ;;  %s131_s24 = scalar_lea.vmem (!%p122_p5), [#allocation2], %s272_s23 }
  0x3d   : > { %453 = dma.done.wait (%p568_p8), %s128_s20, 128  }
  0x3e   : > { %455 = vsyncadd (%p568_p8), %s128_s20, 4294967168  ;;  %s273_s3 = sshll.u32 %s634_s14, 4  ;;  %vm152_vm0 = vcmask 64512   ;;  %v151_v0 = vld [vmem:[%s131_s24] sm:$0xff]  ;;  %s493_s18 = smov 120  }
  0x3f   : > { %s149_s15 = scalar_lea.vmem [#allocation5], %s273_s3  ;;  %155 = vrot.lane.b32.xlu0 %v151_v0, %s493_s18  ;;  %s276_s19 = sshll.u32 %s474_s9, 1 }
  0x40   : > { %153 = vst.msk [vmem:[%s149_s15] sm:$0xff] %vm152_vm0, %v151_v0  ;;  %s277_s28 = sshll.u32 %s478_s10, 2  ;;  %s175_s30 = sshll.u32 %s149_s15, 4  ;;  %s645_s30 = int_to_ptr.vmem [resolvable:$true] %s175_s30 }
  0x41   : > { %s172_s29 = sadd.s32 %s277_s28, %s276_s19  ;;  %s160_s5 = scalar_lea.sflag [#allocation4], %s634_s14 }
  0x42   : > { %s278_s26 = sshll.u32 %s172_s29, 7  ;;  %s392_s23 = scalar_lea.vmem %s645_s30, 256 }
  0x43   : > { %s650_s4 = scalar_lea.hbm %s705_s1, %s278_s26  ;;  %p393_p8 = scmp.ne.s32.totalorder %s645_s30, %s392_s23 }
  0x44   : > { %p714_p9 = scmp.ne.s32.totalorder %s709_s22, 0  ;;  %s494_s9 = smov [#allocation5]  }
  0x45   : > { %s396_s10 = sshll.u32 %s494_s9, 4  ;;  %s397_s10 = int_to_ptr.vmem [resolvable:$false] %s396_s10 }
  0x46   : > { %p394_p12 = pnand %p393_p8, %p714_p9  ;;  %s398_s20 = scalar_lea.vmem %s397_s10, 512 }
  0x47   : > { %p399_p7 = scmp.lt.s32.totalorder %s645_s30, %s397_s10  ;;  %p400_p13 = scmp.lt.s32.totalorder %s398_s20, %s392_s23 }
  0x48   : > { %p395_p0 = pneg %p394_p12 }
  0x49   : > { %p401_p4 = por %p400_p13, %p399_p7 }
  0x4b   : > { %p402_p6 = pnand %p401_p4, %p395_p0 }
  0xb1   : > { %v156_v1 = vpop.permute.xlu0 %155 }
  0xb2   : > { %274 = vst.msk [vmem:[%s149_s15 + $0x8] sm:$0xff] %vm152_vm0, %v156_v1 }
  0xb3   : > { %405 = shalt.err (!%p402_p6)
}
  0xb4   : > { %s406_s24 = scalar_lea.hbm %s650_s4, 256  ;;  %s410_s18 = scalar_lea.hbm %s705_s1, 1024 }
  0xb5   : > { %p407_p3 = scmp.ne.s32.totalorder %s650_s4, %s406_s24  ;;  %p411_p1 = scmp.lt.u32.totalorder %s650_s4, %s705_s1 }
  0xb6   : > { %p412_p2 = scmp.lt.u32.totalorder %s410_s18, %s406_s24  ;;  %p414_p8 = scmp.lt.u32.totalorder %s406_s24, %s650_s4 }
  0xb7   : > { %p408_p10 = pnand %p407_p3, %p714_p9 }
  0xb8   : > { %p413_p5 = por %p412_p2, %p411_p1 }
  0xb9   : > { %p409_p11 = pneg %p408_p10 }
  0xba   : > { %p415_p12 = por %p414_p8, %p413_p5 }
  0xbc   : > { %p416_p0 = pnand %p415_p12, %p409_p11 }
  0xbe   : > { %419 = shalt.err (!%p416_p0)
}
  0xbf   : > { %s495_s29 = smov 128   ;;  %s496_s26 = smov 8  }
  0xc0   : > { %283 = dma.vmem_to_hbm [thread:$0]  (%p714_p9), %s645_s30, 256, %s650_s4, %s160_s5, %s495_s29, %s495_s29, %s496_s26  }
  0xc1 PF: > { %p294_p7 = scmp.ge.s32.totalorder %s490_s13, 2  ;;  %s190_s21 = sand.u32 1, %s462_s6  }
  0xc2   : > { %p715_p13 = scmp.ne.s32.totalorder %s710_s25, 0  ;;  %s191_s2 = scalar_lea.sflag [#allocation4], %s190_s21 }
  0xc4   : > { %p290_p4 = pnand %p294_p7, %p715_p13 }
  0xc6   : > { %457 = dma.done.wait (!%p290_p4), %s191_s2, 256  }
  0xc7   : > { %459 = vsyncadd (!%p290_p4), %s191_s2, 4294967040  ;;  %s17_s13 = sadd.s32 1, %s490_s13   ;;  %s716_s6 = smov %s466_s7 }
  0xc8   : > { %p14_p6 = scmp.ge.s32.totalorder %s17_s13, 6   ;;  %s717_s7 = smov %s470_s8 }
  0xc9   : > { %s718_s8 = smov %s585_s27  ;;  %s719_s9 = smov %s482_s11 }
  0xca   : > { %s720_s10 = smov %s486_s12  ;;  %s721_s11 = smov %s724_s16 }
  0xcb   : > { %s722_s12 = smov %s728_s17  ;;  %16 = sbr.rel (!%p14_p6) target bundleno = 7 (0x7), region = 70 }
  0xd2   :  { %196 = vsyncpa [#allocation3], 1 }
  0xd3   :  { %198 = vsyncpa [#allocation3 + $0x1], 1 }
  0xd4   :  { %199 = vsyncpa [#allocation4], 1 }
  0xd5   :  { %201 = vsyncpa [#allocation4 + $0x1], 1 }

</bundles_post_ra>
